<compile_context>
chip_gen: v5e
topology: v5e:2x2
jax: 0.10.0
libtpu: 0.0.40
codegen_flags: <defaults>
</compile_context>

<pallas_src>
import functools

import jax
import jax.numpy as jnp
from jax.experimental import pallas as pl
from jax.experimental.pallas import tpu as pltpu

_MIB = 1024 * 1024


def _multiply_kernel(x_ref, o_ref, *, score, compute_dtype):
    # Elementwise multiply of the current VMEM tile by the compile-time score,
    # computed in `compute_dtype` (f32 for float outputs) then cast to output.
    x = x_ref[...].astype(compute_dtype)
    o_ref[...] = (x * jnp.asarray(score, dtype=compute_dtype)).astype(o_ref.dtype)


def _result_dtype(x_dtype, score):
    """PyTorch-style weak-scalar promotion: float score + int tensor -> float32."""
    x_dtype = jnp.dtype(x_dtype)
    if isinstance(score, bool) or (isinstance(score, int) and not isinstance(score, bool)):
        return x_dtype
    if jnp.issubdtype(x_dtype, jnp.floating):
        return x_dtype
    return jnp.dtype(jnp.float32)


def _vmem_capacity_bytes():
    """Per-TensorCore VMEM capacity, with defensive fallbacks."""
    try:
        return int(pltpu.get_tpu_info().vmem_capacity_bytes)
    except Exception:
        pass
    try:
        kind = jax.devices()[0].device_kind.lower()
        if "v7" in kind:
            return 64 * _MIB
    except Exception:
        pass
    return 128 * _MIB


def _num_tensorcores():
    """2 TCs per chip on v7x; 1 on v5e/v6e."""
    try:
        kind = jax.devices()[0].device_kind.lower()
        if "v7" in kind:
            return 2
    except Exception:
        pass
    return 1


def _lane_dense_2d(x, sublane):
    """Pure-metadata reshape of x into a lane/sublane-dense 2-D slab.

    Lane-dense output (last dim a multiple of 128, rows >= sublane pack)
    avoids masked vst partial stores. Only reshapes (never transposes), so no
    relayout copy is introduced.
    """
    total = int(x.size)
    if x.ndim >= 2 and x.shape[-1] % 128 == 0:
        return x.reshape(-1, x.shape[-1])
    if total % 128 == 0:
        m = total // 128
        best_cols = 0
        d = 1
        while d * d <= m:
            if m % d == 0:
                for cand in (d, m // d):
                    cols = 128 * cand
                    if total // cols >= sublane and cols > best_cols:
                        best_cols = cols
            d += 1
        if best_cols:
            return x.reshape(total // best_cols, best_cols)
        return x.reshape(m, 128)
    # Not 128-divisible: keep the natural trailing-dim layout (masked edges).
    if x.ndim >= 2:
        return x.reshape(-1, x.shape[-1])
    return x.reshape(1, -1)


def _choose_tiles(N, F, in_itemsize, out_itemsize, target_bytes, num_tc):
    """Pick (tile_rows, tile_f): ~target_bytes per block, sublane/lane aligned."""
    small = max(1, min(in_itemsize, out_itemsize))
    big = max(1, max(in_itemsize, out_itemsize))
    # Sub-32-bit dtypes pack along sublanes: 8 rows f32, 16 bf16, 32 int8/fp8.
    sublane = max(8, 32 // small)

    # Lane tile: take the full feature dim unless even one sublane-group of
    # full rows blows past the target; then use a multiple of 128 lanes.
    if F * big * sublane <= target_bytes or F <= 128:
        tile_f = F
    else:
        tile_f = (target_bytes // (sublane * big)) // 128 * 128
        tile_f = max(128, min(tile_f, F))

    # Row tile: fill the target block size, multiple of the sublane pack,
    # capped at N (a block dim equal to the full array dim is always legal).
    rows = target_bytes // max(1, tile_f * big)
    rows = max(sublane, (rows // sublane) * sublane)
    tile_rows = N if rows >= N else rows

    # Only on 2-TC chips (v7x megacore): split a single block into two row
    # tiles so a "parallel" grid axis can be sharded across both cores.
    # On 1-TC v5e/v6e this would just add an extra sequential grid step.
    if (num_tc >= 2
            and pl.cdiv(N, tile_rows) * pl.cdiv(F, tile_f) == 1
            and N >= 2 * sublane):
        half = -(-N // 2)
        tile_rows = max(sublane, ((half + sublane - 1) // sublane) * sublane)

    return tile_rows, tile_f


def multiply(x, score, *,
             target_block_bytes=8 * _MIB,
             min_pallas_bytes=1 * _MIB,
             donate=False):
    """x * score via a Pallas TPU streaming kernel (elementwise scale).

    Policy note: a standalone x*scalar is best left to XLA fusion; keep
    min_pallas_bytes high unless this op is deliberately isolated.
    """
    if hasattr(score, "item"):
        score = score.item()
    x = jnp.asarray(x)

    out_dtype = _result_dtype(x.dtype, score)
    if jnp.issubdtype(out_dtype, jnp.floating):
        # Promote-to-f32 compute then cast back: PyTorch-faithful for bf16/f16
        # and free for a mem-bound kernel.
        compute_dtype = jnp.promote_types(out_dtype, jnp.float32)
    else:
        compute_dtype = out_dtype

    nbytes = x.size * x.dtype.itemsize
    # Tiny inputs: launch overhead dominates and the custom-call boundary
    # blocks XLA fusion -> do it inline.
    if x.ndim == 0 or x.size == 0 or nbytes < min_pallas_bytes:
        return (x.astype(compute_dtype)
                * jnp.asarray(score, dtype=compute_dtype)).astype(out_dtype)

    in_item = x.dtype.itemsize
    out_item = jnp.dtype(out_dtype).itemsize
    sublane = max(8, 32 // max(1, min(in_item, out_item)))

    orig_shape = x.shape
    x2 = _lane_dense_2d(x, sublane)
    N, F = x2.shape

    vmem_cap = _vmem_capacity_bytes()
    num_tc = _num_tensorcores()
    # Cap the double-buffered in+out working set (~4x block) against this
    # generation's VMEM (binding on v7x's 64 MiB per TensorCore).
    pipeline_budget = min(int(0.65 * vmem_cap), 64 * _MIB)
    block_bytes = max(64 * 1024, min(int(target_block_bytes), pipeline_budget // 4))

    tile_rows, tile_f = _choose_tiles(N, F, in_item, out_item, block_bytes, num_tc)
    grid = (pl.cdiv(N, tile_rows), pl.cdiv(F, tile_f))

    working_set = 2 * tile_rows * tile_f * (in_item + out_item)
    vmem_limit = int(min(int(0.9 * vmem_cap),
                         max(working_set + 4 * _MIB, 32 * _MIB)))

    aliases = {0: 0} if (donate and jnp.dtype(out_dtype) == x.dtype) else {}

    kernel = functools.partial(_multiply_kernel, score=score,
                               compute_dtype=compute_dtype)
    out = pl.pallas_call(
        kernel,
        out_shape=jax.ShapeDtypeStruct((N, F), out_dtype),
        grid_spec=pltpu.PrefetchScalarGridSpec(
            num_scalar_prefetch=0,
            grid=grid,
            in_specs=[pl.BlockSpec((tile_rows, tile_f), lambda i, j: (i, j))],
            out_specs=pl.BlockSpec((tile_rows, tile_f), lambda i, j: (i, j)),
        ),
        compiler_params=pltpu.CompilerParams(
            dimension_semantics=("parallel", "parallel"),
            vmem_limit_bytes=vmem_limit,
        ),
        input_output_aliases=aliases,
    )(x2)
    return out.reshape(orig_shape)


class Multiply:
    """JAX/Pallas equivalent of the PyTorch Multiply module."""

    def __init__(self, score):
        self.score = score

    def __call__(self, x):
        return multiply(x, self.score)


if __name__ == "__main__":
    key = jax.random.PRNGKey(0)
    k1, k2, k3, k4 = jax.random.split(key, 4)
    score = 0.37  # deterministic synthetic "score" parameter
    mod = Multiply(score)

    # 1) Small feature matrix (batch=8, hidden=256), forced through Pallas.
    x1 = jax.random.normal(k1, (8, 256), dtype=jnp.float32)
    o1 = jax.block_until_ready(multiply(x1, score, min_pallas_bytes=0))
    assert o1.shape == x1.shape and o1.dtype == x1.dtype
    assert jnp.allclose(o1, x1 * jnp.float32(score), rtol=1e-6, atol=1e-6)

    # 2) Ragged shape (300, 160): exercises the flatten -> lane-dense (15, 3200)
    #    re-tiling plus a multi-step grid with partial edge blocks.
    x2 = jax.random.normal(k2, (300, 160), dtype=jnp.float32)
    o2 = jax.block_until_ready(
        multiply(x2, score, target_block_bytes=64 * 1024, min_pallas_bytes=0))
    assert o2.shape == x2.shape and o2.dtype == x2.dtype
    assert jnp.allclose(o2, x2 * jnp.float32(score), rtol=1e-6, atol=1e-6)

    # 3) bfloat16 input: promote-to-f32 compute, cast back (PyTorch-faithful).
    x3 = jax.random.normal(k3, (16, 128), dtype=jnp.bfloat16)
    o3 = jax.block_until_ready(multiply(x3, score, min_pallas_bytes=0))
    ref3 = (x3.astype(jnp.float32) * jnp.float32(score)).astype(jnp.bfloat16)
    assert o3.dtype == jnp.bfloat16 and jnp.array_equal(o3, ref3)

    # 4) Integer input with float score -> float32 output (PyTorch promotion).
    x4 = jax.random.randint(k4, (32, 128), -5, 6, dtype=jnp.int32)
    o4 = jax.block_until_ready(multiply(x4, score, min_pallas_bytes=0))
    assert o4.dtype == jnp.float32
    assert jnp.allclose(o4, x4.astype(jnp.float32) * jnp.float32(score),
                        rtol=1e-6, atol=1e-6)

    # 5) Module call on a small input -> plain-JAX fallback path (XLA fuses).
    om = jax.block_until_ready(mod(x1))
    assert om.shape == x1.shape and om.dtype == x1.dtype
    assert jnp.allclose(om, x1 * jnp.float32(score), rtol=1e-6, atol=1e-6)

    print("KERNEL_OK")
</pallas_src>

<mosaic_0001>
module attributes {stable_mosaic.version = 11 : i64} {
  func.func @_multiply_kernel(%arg0: i32, %arg1: i32, %arg2: memref<8x256xf32, #tpu.memory_space<vmem>>, %arg3: memref<8x256xf32, #tpu.memory_space<vmem>>) attributes {dimension_semantics = [#tpu.dimension_semantics<parallel>, #tpu.dimension_semantics<parallel>], iteration_bounds = array<i64: 1, 1>, scalar_prefetch = 0 : i64, scratch_operands = 0 : i64, tpu.core_type = #tpu.core_type<tc>, window_params = [{transform_indices = @transform_0, window_bounds = array<i64: 8, 256>}, {transform_indices = @transform_1, window_bounds = array<i64: 8, 256>}]} {
    %c0 = arith.constant 0 : index
    %c0_0 = arith.constant 0 : index
    %0 = vector.load %arg2[%c0, %c0_0] : memref<8x256xf32, #tpu.memory_space<vmem>>, vector<8x256xf32>
    %cst = arith.constant 3.700000e-01 : f32
    %1 = vector.broadcast %cst : f32 to vector<8x256xf32>
    %2 = arith.mulf %0, %1 : vector<8x256xf32>
    %c0_1 = arith.constant 0 : index
    %c0_2 = arith.constant 0 : index
    %3 = vector.load %arg3[%c0_1, %c0_2] : memref<8x256xf32, #tpu.memory_space<vmem>>, vector<8x256xf32>
    tpu.vector_store %arg3[%c0_1, %c0_2], %2 {strides = array<i32>} : memref<8x256xf32, #tpu.memory_space<vmem>>, vector<8x256xf32>,
    return
  }
  func.func @transform_0(%arg0: i32, %arg1: i32) -> (i32, i32) {
    %c0_i32 = arith.constant 0 : i32
    return %arg0, %arg1 : i32, i32
  }
  func.func @transform_1(%arg0: i32, %arg1: i32) -> (i32, i32) {
    %c0_i32 = arith.constant 0 : i32
    return %arg0, %arg1 : i32, i32
  }
}

</mosaic_0001>

<bundles_post_ra>
// kernel: tpu_custom_call.1
= control target key start
LH: loop header
LB: loop body
LE: loop exit
PB: predicated region body
PF: predicated region fallthrough
CT: control target
= control target key end

     0   :  { %6 = vsyncpa [#allocation3], 0  ;;  %s118_s0 = inlined_call_operand.hbm [shape: f32[8,256], index: 0, kind: input, shape index: {}]   ;;  %s119_s1 = inlined_call_operand.hbm [shape: f32[8,256], index: 1, kind: output, shape index: {}]  }
   0x1   :  { %7 = vsyncpa [#allocation4], 0  ;;  %s13_s8 = sshll.u32 %s118_s0, 4  ;;  %s100_s9 = smov [#allocation2]   ;;  %s14_s8 = int_to_ptr.hbm [resolvable:$true] %s13_s8 }
   0x2   :  { %s15_s10 = sshll.u32 %s100_s9, 4  ;;  %s16_s10 = int_to_ptr.vmem [resolvable:$true] %s15_s10 }
   0x3   :  { %18 = dma.hbm_to_vmem [thread:$0]  %s14_s8, 256, %s16_s10, [#allocation3]  }
   0x4   :  { %96 = dma.done.wait [#allocation3], 256  }
   0x5   :  { %97 = vsyncadd [#allocation3], 4294967040  ;;  %s101_s11 = smov [#allocation5]   ;;  %s36_s15 = sshll.u32 %s119_s1, 4  ;;  %v23_v0 = vld [vmem:[#allocation2] sm:$0xff]  ;;  %v24_v1 = vld [vmem:[#allocation2 + $0x8] sm:$0xff]  ;;  %s37_s15 = int_to_ptr.hbm [resolvable:$true] %s36_s15 }
   0x6   :  { %s34_s12 = sshll.u32 %s101_s11, 4  ;;  %v25_v2 = vmul.f32 0.37, %v23_v0  ;;  %v26_v3 = vmul.f32 0.37, %v24_v1  ;;  %s35_s12 = int_to_ptr.vmem [resolvable:$true] %s34_s12 }
   0x8   :  { %27 = vst [vmem:[#allocation5] sm:$0xff] %v25_v2 }
   0x9   :  { %28 = vst [vmem:[#allocation5 + $0x8] sm:$0xff] %v26_v3 }
   0xa   :  { %39 = dma.vmem_to_hbm [thread:$0]  %s35_s12, 256, %s37_s15, [#allocation4]  }
   0xb   :  { %98 = dma.done.wait [#allocation4], 256  }
   0xc   :  { %99 = vsyncadd [#allocation4], 4294967040 }
   0xd   :  { %44 = vsyncpa [#allocation3], 1 }
   0xe   :  { %45 = vsyncpa [#allocation4], 1 }

</bundles_post_ra>
